<compile_context>
chip_gen: v7x
topology: tpu7x:2x2x1
jax: 0.10.0
libtpu: 0.0.40
codegen_flags: <defaults>
</compile_context>

<pallas_src>
import jax
import jax.numpy as jnp
from jax import lax
from jax.experimental import pallas as pl
from jax.experimental.pallas import tpu as pltpu

LOG2 = 0.6931471805599453


def _round_up(x: int, m: int) -> int:
    return ((x + m - 1) // m) * m


def _shifted_softplus(v):
    # numerically stable softplus(v) - log(2), kept in f32.
    return jnp.maximum(v, 0.0) + jnp.log1p(jnp.exp(-jnp.abs(v))) - LOG2


def _schnet_kernel(
    # scalar prefetch (SMEM)
    idx_j_ref,                       # [P] int32
    # inputs (VMEM)
    x_ref,                           # [N, A]  bf16 (resident)
    fij_ref,                         # [TP, R] bf16 (pair tile)
    idx_i_ref,                       # [1, TP] int32 (pair tile, row vector)
    rcut_ref,                        # [TP, 1] f32   (pair tile, column)
    w_in2f_ref, b_in2f_ref,
    w_f1_ref, b_f1_ref, w_f2_ref, b_f2_ref,
    w_o1_ref, b_o1_ref, w_o2_ref, b_o2_ref,
    # output (VMEM, resident; written on the last grid step only)
    out_ref,                         # [N, A] f32
    # scratch (VMEM, persistent across grid steps)
    xf_ref,                          # [N, F]  f32 : in2f(x), computed once
    agg_ref,                         # [N, F]  f32 : scatter_add accumulator
    xj_ref,                          # [TP, F] f32 : gathered x[idx_j] rows
):
    t = pl.program_id(0)
    tp = fij_ref.shape[0]
    n_pad = xf_ref.shape[0]

    # ---- one-time init: xf = in2f(x); zero the accumulator ------------------
    @pl.when(t == 0)
    def _init():
        xf_ref[...] = (
            jnp.dot(x_ref[...], w_in2f_ref[...], preferred_element_type=jnp.float32)
            + b_in2f_ref[...]
        )
        agg_ref[...] = jnp.zeros_like(agg_ref)

    # ---- filter network on this pair tile (bf16 MXU, f32 accumulate) --------
    h = _shifted_softplus(
        jnp.dot(fij_ref[...], w_f1_ref[...], preferred_element_type=jnp.float32)
        + b_f1_ref[...]
    )                                                                # [TP, F] f32
    w_ij = (
        jnp.dot(h.astype(jnp.bfloat16), w_f2_ref[...],
                preferred_element_type=jnp.float32)
        + b_f2_ref[...]
    )
    w_ij = w_ij * rcut_ref[...]                                      # [TP, F]

    # ---- real gather: x_j = xf[idx_j], row copies from resident scratch -----
    base = t * tp

    def _gather_row(p, carry):
        j = idx_j_ref[base + p]
        xj_ref[pl.ds(p, 1), :] = xf_ref[pl.ds(j, 1), :]
        return carry

    lax.fori_loop(0, tp, _gather_row, 0)

    x_ij = xj_ref[...] * w_ij                                        # [TP, F] f32

    # ---- scatter_add over idx_i: exact one-hot matmul built as [N, TP] ------
    onehot_i = (
        lax.broadcasted_iota(jnp.int32, (n_pad, tp), 0) == idx_i_ref[...]
    ).astype(jnp.bfloat16)                                           # [N, TP]
    agg_ref[...] += jnp.dot(
        onehot_i, x_ij.astype(jnp.bfloat16), preferred_element_type=jnp.float32
    )                                                                # [N, F]

    # ---- last step: f2out MLP ------------------------------------------------
    @pl.when(t == pl.num_programs(0) - 1)
    def _finalize():
        h2 = _shifted_softplus(
            jnp.dot(agg_ref[...].astype(jnp.bfloat16), w_o1_ref[...],
                    preferred_element_type=jnp.float32)
            + b_o1_ref[...]
        )                                                            # [N, A]
        out_ref[...] = (
            jnp.dot(h2.astype(jnp.bfloat16), w_o2_ref[...],
                    preferred_element_type=jnp.float32)
            + b_o2_ref[...]
        )


def schnet_interaction(x, f_ij, idx_i, idx_j, rcut_ij, params, *, pair_tile=None):
    n_atoms, n_atom_basis = x.shape
    n_pairs, n_rbf = f_ij.shape
    n_filters = params["w_f2"].shape[0]

    # Chip-dependent knobs: v7x has 64 MiB VMEM -> halve tile + budget.
    kind = jax.devices()[0].device_kind.lower()
    is_v7 = ("v7" in kind) or ("7x" in kind)
    if pair_tile is None:
        pair_tile = 128 if is_v7 else 256
    vmem_limit = (48 if is_v7 else 96) * 1024 * 1024

    # Lane-dense padding: feature dims -> x128, atoms -> x8, pairs -> x tile.
    A = _round_up(n_atom_basis, 128)
    R = _round_up(n_rbf, 128)
    F = _round_up(n_filters, 128)
    N = _round_up(n_atoms, 8)

    TP = min(pair_tile, _round_up(n_pairs, 8))   # small problems: single tile
    P = _round_up(n_pairs, TP)
    n_tiles = P // TP

    f32, bf16, i32 = jnp.float32, jnp.bfloat16, jnp.int32

    def pad2(a, rows, cols, dtype):
        a = jnp.asarray(a, dtype)
        return jnp.zeros((rows, cols), dtype).at[: a.shape[0], : a.shape[1]].set(a)

    x_p = pad2(x, N, A, bf16)
    fij_p = pad2(f_ij, P, R, bf16)
    # Padded pairs: idx = 0 (stays in-bounds) and rcut = 0 -> zero contribution.
    idx_i_p = jnp.zeros((1, P), i32).at[0, :n_pairs].set(idx_i.astype(i32))
    idx_j_p = jnp.zeros((P,), i32).at[:n_pairs].set(idx_j.astype(i32))
    rcut_p = jnp.zeros((P, 1), f32).at[:n_pairs, 0].set(rcut_ij.astype(f32))

    w_in2f = pad2(params["w_in2f"], A, F, bf16); b_in2f = pad2(params["b_in2f"], 1, F, f32)
    w_f1 = pad2(params["w_f1"], R, F, bf16);     b_f1 = pad2(params["b_f1"], 1, F, f32)
    w_f2 = pad2(params["w_f2"], F, F, bf16);     b_f2 = pad2(params["b_f2"], 1, F, f32)
    w_o1 = pad2(params["w_o1"], F, A, bf16);     b_o1 = pad2(params["b_o1"], 1, A, f32)
    w_o2 = pad2(params["w_o2"], A, A, bf16);     b_o2 = pad2(params["b_o2"], 1, A, f32)

    resident = lambda t, idxj: (0, 0)    # index_maps get the prefetch ref too
    pair_row = lambda t, idxj: (t, 0)
    pair_col = lambda t, idxj: (0, t)

    grid_spec = pltpu.PrefetchScalarGridSpec(
        num_scalar_prefetch=1,
        grid=(n_tiles,),
        in_specs=[
            pl.BlockSpec((N, A), resident),     # x
            pl.BlockSpec((TP, R), pair_row),    # f_ij tile
            pl.BlockSpec((1, TP), pair_col),    # idx_i tile (row for one-hot)
            pl.BlockSpec((TP, 1), pair_row),    # rcut tile
            pl.BlockSpec((A, F), resident), pl.BlockSpec((1, F), resident),   # in2f
            pl.BlockSpec((R, F), resident), pl.BlockSpec((1, F), resident),   # filter 1
            pl.BlockSpec((F, F), resident), pl.BlockSpec((1, F), resident),   # filter 2
            pl.BlockSpec((F, A), resident), pl.BlockSpec((1, A), resident),   # f2out 1
            pl.BlockSpec((A, A), resident), pl.BlockSpec((1, A), resident),   # f2out 2
        ],
        out_specs=pl.BlockSpec((N, A), resident),
        scratch_shapes=[
            pltpu.VMEM((N, F), f32),    # xf = in2f(x)
            pltpu.VMEM((N, F), f32),    # scatter_add accumulator
            pltpu.VMEM((TP, F), f32),   # gathered x[idx_j] tile
        ],
    )

    flops = 2 * (N * A * F + P * R * F + P * F * F + P * N * F + N * F * A + N * A * A) \
        + 6 * P * F
    transcendentals = 2 * (P * F + N * A)      # exp + log1p per softplus element
    bytes_accessed = int(
        2 * N * A + 2 * P * R + 4 * P + 4 * P + 4 * P
        + 2 * (A * F + R * F + F * F + F * A + A * A)
        + 4 * (3 * F + 2 * A)
        + 4 * N * A
    )

    out_padded = pl.pallas_call(
        _schnet_kernel,
        out_shape=jax.ShapeDtypeStruct((N, A), f32),
        grid_spec=grid_spec,
        compiler_params=pltpu.CompilerParams(
            dimension_semantics=("arbitrary",),   # pair axis carries accumulator
            vmem_limit_bytes=vmem_limit,
        ),
        cost_estimate=pl.CostEstimate(
            flops=int(flops),
            transcendentals=int(transcendentals),
            bytes_accessed=bytes_accessed,
        ),
    )(
        idx_j_p,                                   # scalar prefetch (SMEM)
        x_p, fij_p, idx_i_p, rcut_p,
        w_in2f, b_in2f, w_f1, b_f1, w_f2, b_f2, w_o1, b_o1, w_o2, b_o2,
    )
    return out_padded[:n_atoms, :n_atom_basis]


def init_params(key, n_atom_basis, n_rbf, n_filters):
    ks = jax.random.split(key, 10)

    def dense(kw, kb, fan_in, fan_out):
        scale = 1.0 / jnp.sqrt(jnp.float32(fan_in))
        w = jax.random.uniform(kw, (fan_in, fan_out), jnp.float32, -scale, scale)
        b = jax.random.uniform(kb, (1, fan_out), jnp.float32, -scale, scale)
        return w, b

    p = {}
    p["w_in2f"], p["b_in2f"] = dense(ks[0], ks[1], n_atom_basis, n_filters)
    p["w_f1"], p["b_f1"] = dense(ks[2], ks[3], n_rbf, n_filters)
    p["w_f2"], p["b_f2"] = dense(ks[4], ks[5], n_filters, n_filters)
    p["w_o1"], p["b_o1"] = dense(ks[6], ks[7], n_filters, n_atom_basis)
    p["w_o2"], p["b_o2"] = dense(ks[8], ks[9], n_atom_basis, n_atom_basis)
    return p


def _reference(x, f_ij, idx_i, idx_j, rcut_ij, params):
    ssp = lambda v: jnp.logaddexp(v, 0.0) - LOG2
    xf = x @ params["w_in2f"] + params["b_in2f"]
    w_ij = ssp(f_ij @ params["w_f1"] + params["b_f1"]) @ params["w_f2"] + params["b_f2"]
    w_ij = w_ij * rcut_ij[:, None]
    x_ij = xf[idx_j] * w_ij
    agg = jnp.zeros_like(xf).at[idx_i].add(x_ij)
    h = ssp(agg @ params["w_o1"] + params["b_o1"])
    return h @ params["w_o2"] + params["b_o2"]


if __name__ == "__main__":
    n_atoms, n_pairs = 8, 16
    n_atom_basis, n_rbf, n_filters = 32, 16, 32

    key = jax.random.PRNGKey(0)
    k_x, k_f, k_i, k_j, k_r, k_p = jax.random.split(key, 6)

    x = jax.random.normal(k_x, (n_atoms, n_atom_basis), jnp.float32)
    f_ij = jax.random.normal(k_f, (n_pairs, n_rbf), jnp.float32)
    idx_i = jax.random.randint(k_i, (n_pairs,), 0, n_atoms, jnp.int32)
    idx_j = jax.random.randint(k_j, (n_pairs,), 0, n_atoms, jnp.int32)
    rcut_ij = jax.random.uniform(k_r, (n_pairs,), jnp.float32)

    params = init_params(k_p, n_atom_basis, n_rbf, n_filters)

    out = schnet_interaction(x, f_ij, idx_i, idx_j, rcut_ij, params)
    jax.block_until_ready(out)
    assert out.shape == (n_atoms, n_atom_basis)

    # Loose tolerance: kernel uses bf16 MXU operands with f32 accumulation.
    ref = _reference(x, f_ij, idx_i, idx_j, rcut_ij, params)
    assert bool(jnp.allclose(out, ref, rtol=1e-1, atol=1e-1)), "mismatch vs reference"

    print("KERNEL_OK")
</pallas_src>

<mosaic_0001>
module attributes {stable_mosaic.version = 11 : i64} {
  func.func @_schnet_kernel(%arg0: i32, %arg1: memref<16xi32, #tpu.memory_space<smem>>, %arg2: memref<8x128xbf16, #tpu.memory_space<vmem>>, %arg3: memref<16x128xbf16, #tpu.memory_space<vmem>>, %arg4: memref<1x16xi32, #tpu.memory_space<vmem>>, %arg5: memref<16x1xf32, #tpu.memory_space<vmem>>, %arg6: memref<128x128xbf16, #tpu.memory_space<vmem>>, %arg7: memref<1x128xf32, #tpu.memory_space<vmem>>, %arg8: memref<128x128xbf16, #tpu.memory_space<vmem>>, %arg9: memref<1x128xf32, #tpu.memory_space<vmem>>, %arg10: memref<128x128xbf16, #tpu.memory_space<vmem>>, %arg11: memref<1x128xf32, #tpu.memory_space<vmem>>, %arg12: memref<128x128xbf16, #tpu.memory_space<vmem>>, %arg13: memref<1x128xf32, #tpu.memory_space<vmem>>, %arg14: memref<128x128xbf16, #tpu.memory_space<vmem>>, %arg15: memref<1x128xf32, #tpu.memory_space<vmem>>, %arg16: memref<8x128xf32, #tpu.memory_space<vmem>>, %arg17: memref<8x128xf32, #tpu.memory_space<vmem>>, %arg18: memref<8x128xf32, #tpu.memory_space<vmem>>, %arg19: memref<16x128xf32, #tpu.memory_space<vmem>>) attributes {dimension_semantics = [#tpu.dimension_semantics<arbitrary>], iteration_bounds = array<i64: 1>, scalar_prefetch = 1 : i64, scratch_operands = 3 : i64, tpu.core_type = #tpu.core_type<tc>, window_params = [{pipeline_mode = #tpu.pipeline_mode<synchronous>, transform_indices = @transform_0, window_bounds = array<i64: 8, 128>}, {transform_indices = @transform_1, window_bounds = array<i64: 16, 128>}, {transform_indices = @transform_2, window_bounds = array<i64: 1, 16>}, {transform_indices = @transform_3, window_bounds = array<i64: 16, 1>}, {pipeline_mode = #tpu.pipeline_mode<synchronous>, transform_indices = @transform_4, window_bounds = array<i64: 128, 128>}, {pipeline_mode = #tpu.pipeline_mode<synchronous>, transform_indices = @transform_5, window_bounds = array<i64: 1, 128>}, {pipeline_mode = #tpu.pipeline_mode<synchronous>, transform_indices = @transform_6, window_bounds = array<i64: 128, 128>}, {pipeline_mode = #tpu.pipeline_mode<synchronous>, transform_indices = @transform_7, window_bounds = array<i64: 1, 128>}, {pipeline_mode = #tpu.pipeline_mode<synchronous>, transform_indices = @transform_8, window_bounds = array<i64: 128, 128>}, {pipeline_mode = #tpu.pipeline_mode<synchronous>, transform_indices = @transform_9, window_bounds = array<i64: 1, 128>}, {pipeline_mode = #tpu.pipeline_mode<synchronous>, transform_indices = @transform_10, window_bounds = array<i64: 128, 128>}, {pipeline_mode = #tpu.pipeline_mode<synchronous>, transform_indices = @transform_11, window_bounds = array<i64: 1, 128>}, {pipeline_mode = #tpu.pipeline_mode<synchronous>, transform_indices = @transform_12, window_bounds = array<i64: 128, 128>}, {pipeline_mode = #tpu.pipeline_mode<synchronous>, transform_indices = @transform_13, window_bounds = array<i64: 1, 128>}, {pipeline_mode = #tpu.pipeline_mode<synchronous>, transform_indices = @transform_14, window_bounds = array<i64: 8, 128>}]} {
    %c0_i32 = arith.constant 0 : i32
    %0 = arith.cmpi eq, %arg0, %c0_i32 : i32
    %1 = arith.extui %0 : i1 to i32
    %c0_i32_0 = arith.constant 0 : i32
    %2 = arith.cmpi ne, %1, %c0_i32_0 : i32
    scf.if %2 {
      %c0_30 = arith.constant 0 : index
      %c0_31 = arith.constant 0 : index
      %47 = vector.load %arg2[%c0_30, %c0_31] : memref<8x128xbf16, #tpu.memory_space<vmem>>, vector<8x128xbf16>
      %c0_32 = arith.constant 0 : index
      %c0_33 = arith.constant 0 : index
      %48 = vector.load %arg6[%c0_32, %c0_33] : memref<128x128xbf16, #tpu.memory_space<vmem>>, vector<128x128xbf16>
      %cst_34 = arith.constant dense<0.000000e+00> : vector<8x128xf32>
      %49 = tpu.matmul %47, %48, %cst_34 {dimension_numbers = #tpu.dot_dimension_numbers<[1], [0], [0], [1], [0, 0, 1, 1], [], []>} : vector<8x128xbf16>, vector<128x128xbf16>, vector<8x128xf32> -> vector<8x128xf32>
      %c0_35 = arith.constant 0 : index
      %c0_36 = arith.constant 0 : index
      %50 = vector.load %arg7[%c0_35, %c0_36] : memref<1x128xf32, #tpu.memory_space<vmem>>, vector<1x128xf32>
      %51 = vector.broadcast %50 : vector<1x128xf32> to vector<8x128xf32>
      %52 = arith.addf %49, %51 : vector<8x128xf32>
      %c0_37 = arith.constant 0 : index
      %c0_38 = arith.constant 0 : index
      %53 = vector.load %arg17[%c0_37, %c0_38] : memref<8x128xf32, #tpu.memory_space<vmem>>, vector<8x128xf32>
      tpu.vector_store %arg17[%c0_37, %c0_38], %52 {strides = array<i32>} : memref<8x128xf32, #tpu.memory_space<vmem>>, vector<8x128xf32>,
      %cst_39 = arith.constant 0.000000e+00 : f32
      %54 = vector.broadcast %cst_39 : f32 to vector<8x128xf32>
      %c0_40 = arith.constant 0 : index
      %c0_41 = arith.constant 0 : index
      %55 = vector.load %arg18[%c0_40, %c0_41] : memref<8x128xf32, #tpu.memory_space<vmem>>, vector<8x128xf32>
      tpu.vector_store %arg18[%c0_40, %c0_41], %54 {strides = array<i32>} : memref<8x128xf32, #tpu.memory_space<vmem>>, vector<8x128xf32>,
    } else {
    }
    %c0 = arith.constant 0 : index
    %c0_1 = arith.constant 0 : index
    %3 = vector.load %arg3[%c0, %c0_1] : memref<16x128xbf16, #tpu.memory_space<vmem>>, vector<16x128xbf16>
    %c0_2 = arith.constant 0 : index
    %c0_3 = arith.constant 0 : index
    %4 = vector.load %arg8[%c0_2, %c0_3] : memref<128x128xbf16, #tpu.memory_space<vmem>>, vector<128x128xbf16>
    %cst = arith.constant dense<0.000000e+00> : vector<16x128xf32>
    %5 = tpu.matmul %3, %4, %cst {dimension_numbers = #tpu.dot_dimension_numbers<[1], [0], [0], [1], [0, 0, 1, 1], [], []>} : vector<16x128xbf16>, vector<128x128xbf16>, vector<16x128xf32> -> vector<16x128xf32>
    %c0_4 = arith.constant 0 : index
    %c0_5 = arith.constant 0 : index
    %6 = vector.load %arg9[%c0_4, %c0_5] : memref<1x128xf32, #tpu.memory_space<vmem>>, vector<1x128xf32>
    %7 = vector.broadcast %6 : vector<1x128xf32> to vector<16x128xf32>
    %8 = arith.addf %5, %7 : vector<16x128xf32>
    %cst_6 = arith.constant 0.000000e+00 : f32
    %9 = vector.broadcast %cst_6 : f32 to vector<16x128xf32>
    %10 = arith.maximumf %8, %9 : vector<16x128xf32>
    %11 = math.absf %8 : vector<16x128xf32>
    %cst_7 = arith.constant 0.000000e+00 : f32
    %12 = vector.broadcast %cst_7 : f32 to vector<16x128xf32>
    %13 = arith.subf %12, %11 : vector<16x128xf32>
    %14 = math.exp %13 : vector<16x128xf32>
    %15 = math.log1p %14 : vector<16x128xf32>
    %16 = arith.addf %10, %15 : vector<16x128xf32>
    %cst_8 = arith.constant 0.693147182 : f32
    %17 = vector.broadcast %cst_8 : f32 to vector<16x128xf32>
    %18 = arith.subf %16, %17 : vector<16x128xf32>
    %19 = arith.truncf %18 : vector<16x128xf32> to vector<16x128xbf16>
    %c0_9 = arith.constant 0 : index
    %c0_10 = arith.constant 0 : index
    %20 = vector.load %arg10[%c0_9, %c0_10] : memref<128x128xbf16, #tpu.memory_space<vmem>>, vector<128x128xbf16>
    %cst_11 = arith.constant dense<0.000000e+00> : vector<16x128xf32>
    %21 = tpu.matmul %19, %20, %cst_11 {dimension_numbers = #tpu.dot_dimension_numbers<[1], [0], [0], [1], [0, 0, 1, 1], [], []>} : vector<16x128xbf16>, vector<128x128xbf16>, vector<16x128xf32> -> vector<16x128xf32>
    %c0_12 = arith.constant 0 : index
    %c0_13 = arith.constant 0 : index
    %22 = vector.load %arg11[%c0_12, %c0_13] : memref<1x128xf32, #tpu.memory_space<vmem>>, vector<1x128xf32>
    %23 = vector.broadcast %22 : vector<1x128xf32> to vector<16x128xf32>
    %24 = arith.addf %21, %23 : vector<16x128xf32>
    %c0_14 = arith.constant 0 : index
    %c0_15 = arith.constant 0 : index
    %25 = vector.load %arg5[%c0_14, %c0_15] : memref<16x1xf32, #tpu.memory_space<vmem>>, vector<16x1xf32>
    %26 = vector.broadcast %25 : vector<16x1xf32> to vector<16x128xf32>
    %27 = arith.mulf %24, %26 : vector<16x128xf32>
    %c16_i32 = arith.constant 16 : i32
    %28 = arith.muli %arg0, %c16_i32 : i32
    %c0_i32_16 = arith.constant 0 : i32
    %c16_i32_17 = arith.constant 16 : i32
    %29 = arith.addi %c0_i32_16, %c16_i32_17 : i32
    %c1_i32 = arith.constant 1 : i32
    scf.for %arg20 = %c0_i32_16 to %29 step %c1_i32  : i32 {
      %47 = arith.addi %28, %arg20 : i32
      %48 = arith.index_cast %47 : i32 to index
      %49 = memref.load %arg1[%48] : memref<16xi32, #tpu.memory_space<smem>>
      %50 = arith.index_cast %49 : i32 to index
      %c0_30 = arith.constant 0 : index
      %51 = vector.load %arg17[%50, %c0_30] : memref<8x128xf32, #tpu.memory_space<vmem>>, vector<1x128xf32>
      %52 = arith.index_cast %arg20 : i32 to index
      %c0_31 = arith.constant 0 : index
      %53 = vector.load %arg19[%52, %c0_31] : memref<16x128xf32, #tpu.memory_space<vmem>>, vector<1x128xf32>
      tpu.vector_store %arg19[%52, %c0_31], %51 {strides = array<i32>} : memref<16x128xf32, #tpu.memory_space<vmem>>, vector<1x128xf32>,
    }
    %c16_i32_18 = arith.constant 16 : i32
    %c0_19 = arith.constant 0 : index
    %c0_20 = arith.constant 0 : index
    %30 = vector.load %arg19[%c0_19, %c0_20] : memref<16x128xf32, #tpu.memory_space<vmem>>, vector<16x128xf32>
    %31 = arith.mulf %30, %27 : vector<16x128xf32>
    %32 = tpu.iota {dimensions = array<i32: 0>} : vector<8x16xi32>
    %c0_21 = arith.constant 0 : index
    %c0_22 = arith.constant 0 : index
    %33 = vector.load %arg4[%c0_21, %c0_22] : memref<1x16xi32, #tpu.memory_space<vmem>>, vector<1x16xi32>
    %34 = vector.broadcast %33 : vector<1x16xi32> to vector<8x16xi32>
    %35 = arith.cmpi eq, %32, %34 : vector<8x16xi32>
    %36 = arith.extui %35 : vector<8x16xi1> to vector<8x16xi32>
    %37 = arith.sitofp %36 : vector<8x16xi32> to vector<8x16xf32>
    %38 = arith.truncf %37 : vector<8x16xf32> to vector<8x16xbf16>
    %c0_23 = arith.constant 0 : index
    %c0_24 = arith.constant 0 : index
    %39 = vector.load %arg18[%c0_23, %c0_24] : memref<8x128xf32, #tpu.memory_space<vmem>>, vector<8x128xf32>
    %40 = arith.truncf %31 : vector<16x128xf32> to vector<16x128xbf16>
    %cst_25 = arith.constant dense<0.000000e+00> : vector<8x128xf32>
    %41 = tpu.matmul %38, %40, %cst_25 {dimension_numbers = #tpu.dot_dimension_numbers<[1], [0], [0], [1], [0, 0, 1, 1], [], []>} : vector<8x16xbf16>, vector<16x128xbf16>, vector<8x128xf32> -> vector<8x128xf32>
    %42 = arith.addf %39, %41 : vector<8x128xf32>
    %c0_26 = arith.constant 0 : index
    %c0_27 = arith.constant 0 : index
    %43 = vector.load %arg18[%c0_26, %c0_27] : memref<8x128xf32, #tpu.memory_space<vmem>>, vector<8x128xf32>
    tpu.vector_store %arg18[%c0_26, %c0_27], %42 {strides = array<i32>} : memref<8x128xf32, #tpu.memory_space<vmem>>, vector<8x128xf32>,
    %c0_i32_28 = arith.constant 0 : i32
    %44 = arith.cmpi eq, %arg0, %c0_i32_28 : i32
    %45 = arith.extui %44 : i1 to i32
    %c0_i32_29 = arith.constant 0 : i32
    %46 = arith.cmpi ne, %45, %c0_i32_29 : i32
    scf.if %46 {
      %c0_30 = arith.constant 0 : index
      %c0_31 = arith.constant 0 : index
      %47 = vector.load %arg18[%c0_30, %c0_31] : memref<8x128xf32, #tpu.memory_space<vmem>>, vector<8x128xf32>
      %48 = arith.truncf %47 : vector<8x128xf32> to vector<8x128xbf16>
      %c0_32 = arith.constant 0 : index
      %c0_33 = arith.constant 0 : index
      %49 = vector.load %arg12[%c0_32, %c0_33] : memref<128x128xbf16, #tpu.memory_space<vmem>>, vector<128x128xbf16>
      %cst_34 = arith.constant dense<0.000000e+00> : vector<8x128xf32>
      %50 = tpu.matmul %48, %49, %cst_34 {dimension_numbers = #tpu.dot_dimension_numbers<[1], [0], [0], [1], [0, 0, 1, 1], [], []>} : vector<8x128xbf16>, vector<128x128xbf16>, vector<8x128xf32> -> vector<8x128xf32>
      %c0_35 = arith.constant 0 : index
      %c0_36 = arith.constant 0 : index
      %51 = vector.load %arg13[%c0_35, %c0_36] : memref<1x128xf32, #tpu.memory_space<vmem>>, vector<1x128xf32>
      %52 = vector.broadcast %51 : vector<1x128xf32> to vector<8x128xf32>
      %53 = arith.addf %50, %52 : vector<8x128xf32>
      %cst_37 = arith.constant 0.000000e+00 : f32
      %54 = vector.broadcast %cst_37 : f32 to vector<8x128xf32>
      %55 = arith.maximumf %53, %54 : vector<8x128xf32>
      %56 = math.absf %53 : vector<8x128xf32>
      %cst_38 = arith.constant 0.000000e+00 : f32
      %57 = vector.broadcast %cst_38 : f32 to vector<8x128xf32>
      %58 = arith.subf %57, %56 : vector<8x128xf32>
      %59 = math.exp %58 : vector<8x128xf32>
      %60 = math.log1p %59 : vector<8x128xf32>
      %61 = arith.addf %55, %60 : vector<8x128xf32>
      %cst_39 = arith.constant 0.693147182 : f32
      %62 = vector.broadcast %cst_39 : f32 to vector<8x128xf32>
      %63 = arith.subf %61, %62 : vector<8x128xf32>
      %64 = arith.truncf %63 : vector<8x128xf32> to vector<8x128xbf16>
      %c0_40 = arith.constant 0 : index
      %c0_41 = arith.constant 0 : index
      %65 = vector.load %arg14[%c0_40, %c0_41] : memref<128x128xbf16, #tpu.memory_space<vmem>>, vector<128x128xbf16>
      %cst_42 = arith.constant dense<0.000000e+00> : vector<8x128xf32>
      %66 = tpu.matmul %64, %65, %cst_42 {dimension_numbers = #tpu.dot_dimension_numbers<[1], [0], [0], [1], [0, 0, 1, 1], [], []>} : vector<8x128xbf16>, vector<128x128xbf16>, vector<8x128xf32> -> vector<8x128xf32>
      %c0_43 = arith.constant 0 : index
      %c0_44 = arith.constant 0 : index
      %67 = vector.load %arg15[%c0_43, %c0_44] : memref<1x128xf32, #tpu.memory_space<vmem>>, vector<1x128xf32>
      %68 = vector.broadcast %67 : vector<1x128xf32> to vector<8x128xf32>
      %69 = arith.addf %66, %68 : vector<8x128xf32>
      %c0_45 = arith.constant 0 : index
      %c0_46 = arith.constant 0 : index
      %70 = vector.load %arg16[%c0_45, %c0_46] : memref<8x128xf32, #tpu.memory_space<vmem>>, vector<8x128xf32>
      tpu.vector_store %arg16[%c0_45, %c0_46], %69 {strides = array<i32>} : memref<8x128xf32, #tpu.memory_space<vmem>>, vector<8x128xf32>,
    } else {
    }
    return
  }
  func.func @transform_0(%arg0: i32, %arg1: memref<16xi32, #tpu.memory_space<smem>>) -> (i32, i32) {
    %c0_i32 = arith.constant 0 : i32
    %c0_i32_0 = arith.constant 0 : i32
    %c0_i32_1 = arith.constant 0 : i32
    return %c0_i32, %c0_i32_0 : i32, i32
  }
  func.func @transform_1(%arg0: i32, %arg1: memref<16xi32, #tpu.memory_space<smem>>) -> (i32, i32) {
    %c0_i32 = arith.constant 0 : i32
    %c0_i32_0 = arith.constant 0 : i32
    return %arg0, %c0_i32 : i32, i32
  }
  func.func @transform_2(%arg0: i32, %arg1: memref<16xi32, #tpu.memory_space<smem>>) -> (i32, i32) {
    %c0_i32 = arith.constant 0 : i32
    %c0_i32_0 = arith.constant 0 : i32
    return %c0_i32, %arg0 : i32, i32
  }
  func.func @transform_3(%arg0: i32, %arg1: memref<16xi32, #tpu.memory_space<smem>>) -> (i32, i32) {
    %c0_i32 = arith.constant 0 : i32
    %c0_i32_0 = arith.constant 0 : i32
    return %arg0, %c0_i32 : i32, i32
  }
  func.func @transform_4(%arg0: i32, %arg1: memref<16xi32, #tpu.memory_space<smem>>) -> (i32, i32) {
    %c0_i32 = arith.constant 0 : i32
    %c0_i32_0 = arith.constant 0 : i32
    %c0_i32_1 = arith.constant 0 : i32
    return %c0_i32, %c0_i32_0 : i32, i32
  }
  func.func @transform_5(%arg0: i32, %arg1: memref<16xi32, #tpu.memory_space<smem>>) -> (i32, i32) {
    %c0_i32 = arith.constant 0 : i32
    %c0_i32_0 = arith.constant 0 : i32
    %c0_i32_1 = arith.constant 0 : i32
    return %c0_i32, %c0_i32_0 : i32, i32
  }
  func.func @transform_6(%arg0: i32, %arg1: memref<16xi32, #tpu.memory_space<smem>>) -> (i32, i32) {
    %c0_i32 = arith.constant 0 : i32
    %c0_i32_0 = arith.constant 0 : i32
    %c0_i32_1 = arith.constant 0 : i32
    return %c0_i32, %c0_i32_0 : i32, i32
  }
  func.func @transform_7(%arg0: i32, %arg1: memref<16xi32, #tpu.memory_space<smem>>) -> (i32, i32) {
    %c0_i32 = arith.constant 0 : i32
    %c0_i32_0 = arith.constant 0 : i32
    %c0_i32_1 = arith.constant 0 : i32
    return %c0_i32, %c0_i32_0 : i32, i32
  }
  func.func @transform_8(%arg0: i32, %arg1: memref<16xi32, #tpu.memory_space<smem>>) -> (i32, i32) {
    %c0_i32 = arith.constant 0 : i32
    %c0_i32_0 = arith.constant 0 : i32
    %c0_i32_1 = arith.constant 0 : i32
    return %c0_i32, %c0_i32_0 : i32, i32
  }
  func.func @transform_9(%arg0: i32, %arg1: memref<16xi32, #tpu.memory_space<smem>>) -> (i32, i32) {
    %c0_i32 = arith.constant 0 : i32
    %c0_i32_0 = arith.constant 0 : i32
    %c0_i32_1 = arith.constant 0 : i32
    return %c0_i32, %c0_i32_0 : i32, i32
  }
  func.func @transform_10(%arg0: i32, %arg1: memref<16xi32, #tpu.memory_space<smem>>) -> (i32, i32) {
    %c0_i32 = arith.constant 0 : i32
    %c0_i32_0 = arith.constant 0 : i32
    %c0_i32_1 = arith.constant 0 : i32
    return %c0_i32, %c0_i32_0 : i32, i32
  }
  func.func @transform_11(%arg0: i32, %arg1: memref<16xi32, #tpu.memory_space<smem>>) -> (i32, i32) {
    %c0_i32 = arith.constant 0 : i32
    %c0_i32_0 = arith.constant 0 : i32
    %c0_i32_1 = arith.constant 0 : i32
    return %c0_i32, %c0_i32_0 : i32, i32
  }
  func.func @transform_12(%arg0: i32, %arg1: memref<16xi32, #tpu.memory_space<smem>>) -> (i32, i32) {
    %c0_i32 = arith.constant 0 : i32
    %c0_i32_0 = arith.constant 0 : i32
    %c0_i32_1 = arith.constant 0 : i32
    return %c0_i32, %c0_i32_0 : i32, i32
  }
  func.func @transform_13(%arg0: i32, %arg1: memref<16xi32, #tpu.memory_space<smem>>) -> (i32, i32) {
    %c0_i32 = arith.constant 0 : i32
    %c0_i32_0 = arith.constant 0 : i32
    %c0_i32_1 = arith.constant 0 : i32
    return %c0_i32, %c0_i32_0 : i32, i32
  }
  func.func @transform_14(%arg0: i32, %arg1: memref<16xi32, #tpu.memory_space<smem>>) -> (i32, i32) {
    %c0_i32 = arith.constant 0 : i32
    %c0_i32_0 = arith.constant 0 : i32
    %c0_i32_1 = arith.constant 0 : i32
    return %c0_i32, %c0_i32_0 : i32, i32
  }
}

</mosaic_0001>

<bundles_post_ra>
// kernel: tpu_custom_call.1
= control target key start
LH: loop header
LB: loop body
LE: loop exit
PB: predicated region body
PF: predicated region fallthrough
CT: control target
= control target key end

     0   :  { %s2017_s0 = inlined_call_operand.hbm [shape: s32[16], index: 0, kind: input, shape index: {}]   ;;  %s2018_s1 = inlined_call_operand.hbm [shape: bf16[8,128], index: 1, kind: input, shape index: {}]   ;;  %s2019_s2 = inlined_call_operand.hbm [shape: bf16[16,128], index: 2, kind: input, shape index: {}]   ;;  %s2020_s3 = inlined_call_operand.hbm [shape: s32[1,16], index: 3, kind: input, shape index: {}]   ;;  %s2021_s4 = inlined_call_operand.hbm [shape: f32[16,1], index: 4, kind: input, shape index: {}]   ;;  %s2022_s5 = inlined_call_operand.hbm [shape: bf16[128,128], index: 5, kind: input, shape index: {}]   ;;  %s2023_s6 = inlined_call_operand.hbm [shape: f32[1,128], index: 6, kind: input, shape index: {}]   ;;  %s2024_s7 = inlined_call_operand.hbm [shape: bf16[128,128], index: 7, kind: input, shape index: {}]   ;;  %s2025_s8 = inlined_call_operand.hbm [shape: f32[1,128], index: 8, kind: input, shape index: {}]   ;;  %s2026_s9 = inlined_call_operand.hbm [shape: bf16[128,128], index: 9, kind: input, shape index: {}]   ;;  %s2027_s10 = inlined_call_operand.hbm [shape: f32[1,128], index: 10, kind: input, shape index: {}]   ;;  %s2028_s11 = inlined_call_operand.hbm [shape: bf16[128,128], index: 11, kind: input, shape index: {}]   ;;  %s2029_s12 = inlined_call_operand.hbm [shape: f32[1,128], index: 12, kind: input, shape index: {}]   ;;  %s2030_s13 = inlined_call_operand.hbm [shape: bf16[128,128], index: 13, kind: input, shape index: {}]   ;;  %s2031_s14 = inlined_call_operand.hbm [shape: f32[1,128], index: 14, kind: input, shape index: {}]   ;;  %s2032_s15 = inlined_call_operand.hbm [shape: f32[8,128], index: 15, kind: output, shape index: {}]  }
   0x1   :  { %s1267_s20 = scalar_lea.hbm %s2017_s0, 16 }
   0x2   :  { %p1268_p0 = scmp.ne.s32.totalorder %s2017_s0, %s1267_s20  ;;  %p1271_p1 = scmp.lt.u32.totalorder %s1267_s20, %s2017_s0 }
   0x4   :  { %p1273_p2 = pnand %p1271_p1, %p1268_p0 }
   0x6   :  { %1276 = shalt.err (!%p1273_p2)  }
   0x7   :  { %s1635_s25 = smov [#allocation6]  }
   0x8   :  { %21 = dma.hbm_to_smem %s2017_s0, 16, %s1635_s25, [#allocation5] }
   0x9   :  { %1611 = dma.done.wait [#allocation5], 16 }
   0xa   :  { %1612 = vsyncadd [#allocation5], 4294967280 }
   0xb   :  { %23 = sfence }
   0xc   :  { %24 = vsyncpa [#allocation8], 0 }
   0xd   :  { %25 = vsyncpa [#allocation11], 0 }
   0xe   :  { %26 = vsyncpa [#allocation14], 0 }
   0xf   :  { %27 = vsyncpa [#allocation17], 0 }
  0x10   :  { %28 = vsyncpa [#allocation20], 0 }
  0x11   :  { %29 = vsyncpa [#allocation23], 0 }
  0x12   :  { %30 = vsyncpa [#allocation26], 0 }
  0x13   :  { %31 = vsyncpa [#allocation29], 0 }
  0x14   :  { %32 = vsyncpa [#allocation9], 0  ;;  %s1636_s28 = smov [#allocation10]   ;;  %s1277_s17 = scalar_lea.hbm %s2019_s2, 128 }
  0x15   :  { %s48_s29 = sshll.u32 %s1636_s28, 4  ;;  %p1278_p3 = scmp.ne.s32.totalorder %s2019_s2, %s1277_s17  ;;  %s49_s29 = int_to_ptr.vmem [resolvable:$true] %s48_s29 }
  0x16   :  { %p1281_p4 = scmp.lt.u32.totalorder %s1277_s17, %s2019_s2 }
  0x18   :  { %p1283_p5 = pnand %p1281_p4, %p1278_p3 }
  0x1a   :  { %1286 = shalt.err (!%p1283_p5)
}
  0x1b   :  { %s1287_s21 = scalar_lea.vmem %s49_s29, 128  ;;  %p1292_p7 = scmp.lt.s32.totalorder %s49_s29, %s49_s29 }
  0x1c   :  { %p1288_p6 = scmp.ne.s32.totalorder %s49_s29, %s1287_s21  ;;  %p1293_p8 = scmp.lt.s32.totalorder %s1287_s21, %s1287_s21 }
  0x1e   :  { %p1294_p9 = por %p1293_p8, %p1292_p7 }
  0x20   :  { %p1295_p10 = pnand %p1294_p9, %p1288_p6 }
  0x22   :  { %1298 = shalt.err (!%p1295_p10)
}
  0x23   :  { %s2033_s22 = smov 64   ;;  %s1638_s23 = smov 4  }
  0x24   :  { %54 = dma.hbm_to_vmem [thread:$0]  %s2019_s2, 128, %s49_s29, [#allocation11], %s2033_s22, %s2033_s22, %s1638_s23  }
  0x25   :  { %s1639_s26 = smov [#allocation13]   ;;  %s1299_s16 = scalar_lea.hbm %s2021_s4, 256 }
  0x26   :  { %s70_s27 = sshll.u32 %s1639_s26, 4  ;;  %p1300_p11 = scmp.ne.s32.totalorder %s2021_s4, %s1299_s16  ;;  %s71_s27 = int_to_ptr.vmem [resolvable:$true] %s70_s27 }
  0x27   :  { %p1303_p12 = scmp.lt.u32.totalorder %s1299_s16, %s2021_s4 }
  0x29   :  { %p1305_p13 = pnand %p1303_p12, %p1300_p11 }
  0x2b   :  { %1308 = shalt.err (!%p1305_p13)
}
  0x2c   :  { %s1309_s20 = scalar_lea.vmem %s71_s27, 256  ;;  %p1314_p1 = scmp.lt.s32.totalorder %s71_s27, %s71_s27 }
  0x2d   :  { %p1310_p0 = scmp.ne.s32.totalorder %s71_s27, %s1309_s20  ;;  %p1315_p2 = scmp.lt.s32.totalorder %s1309_s20, %s1309_s20 }
  0x2f   :  { %p1316_p3 = por %p1315_p2, %p1314_p1 }
  0x31   :  { %p1317_p4 = pnand %p1316_p3, %p1310_p0 }
  0x33   :  { %1320 = shalt.err (!%p1317_p4)
}
  0x34   :  { %s1640_s2 = smov 128   ;;  %s1641_s29 = smov 8  }
  0x35   :  { %76 = dma.hbm_to_vmem [thread:$0]  %s2021_s4, 256, %s71_s27, [#allocation14], %s1640_s2, %s1640_s2, %s1641_s29  }
  0x36   :  { %s1642_s25 = smov [#allocation16]   ;;  %s1643_s28 = smov [#allocation19]  }
  0x37   :  { %s95_s26 = sshll.u32 %s1642_s25, 4  ;;  %s117_s30 = sshll.u32 %s1643_s28, 4  ;;  %s96_s26 = int_to_ptr.vmem [resolvable:$true] %s95_s26  ;;  %s118_s30 = int_to_ptr.vmem [resolvable:$true] %s117_s30 }
  0x38   :  { %s1321_s0 = scalar_lea.hbm %s2023_s6, 16 }
  0x39   :  { %p1322_p5 = scmp.ne.s32.totalorder %s2023_s6, %s1321_s0  ;;  %p1325_p6 = scmp.lt.u32.totalorder %s1321_s0, %s2023_s6 }
  0x3b   :  { %p1327_p7 = pnand %p1325_p6, %p1322_p5 }
  0x3d   :  { %1330 = shalt.err (!%p1327_p7)
}
  0x3e   :  { %s1331_s4 = scalar_lea.vmem %s96_s26, 16  ;;  %s1335_s27 = scalar_lea.vmem %s96_s26, 32 }
  0x3f   :  { %p1332_p8 = scmp.ne.s32.totalorder %s96_s26, %s1331_s4  ;;  %p1336_p9 = scmp.lt.s32.totalorder %s96_s26, %s96_s26 }
  0x40   :  { %p1337_p10 = scmp.lt.s32.totalorder %s1335_s27, %s1331_s4 }
  0x42   :  { %p1338_p11 = por %p1337_p10, %p1336_p9 }
  0x44   :  { %p1339_p12 = pnand %p1338_p11, %p1332_p8 }
  0x46   :  { %1342 = shalt.err (!%p1339_p12)
}
  0x47   :  { %98 = dma.hbm_to_vmem [thread:$0]  %s2023_s6, 16, %s96_s26, [#allocation17]  }
  0x48   :  { %s1343_s25 = scalar_lea.hbm %s2025_s8, 16 }
  0x49   :  { %p1344_p13 = scmp.ne.s32.totalorder %s2025_s8, %s1343_s25  ;;  %p1347_p0 = scmp.lt.u32.totalorder %s1343_s25, %s2025_s8 }
  0x4b   :  { %p1349_p1 = pnand %p1347_p0, %p1344_p13 }
  0x4d   :  { %1352 = shalt.err (!%p1349_p1)
}
  0x4e   :  { %s1353_s0 = scalar_lea.vmem %s118_s30, 16  ;;  %s1357_s18 = scalar_lea.vmem %s118_s30, 32 }
  0x4f   :  { %p1354_p2 = scmp.ne.s32.totalorder %s118_s30, %s1353_s0  ;;  %p1358_p3 = scmp.lt.s32.totalorder %s118_s30, %s118_s30 }
  0x50   :  { %p1359_p4 = scmp.lt.s32.totalorder %s1357_s18, %s1353_s0 }
  0x52   :  { %p1360_p5 = por %p1359_p4, %p1358_p3 }
  0x54   :  { %p1361_p6 = pnand %p1360_p5, %p1354_p2 }
  0x56   :  { %1364 = shalt.err (!%p1361_p6)
}
  0x57   :  { %120 = dma.hbm_to_vmem [thread:$0]  %s2025_s8, 16, %s118_s30, [#allocation20]  }
  0x58   :  { %s1644_s19 = smov [#allocation22]   ;;  %s1645_s4 = smov [#allocation25]  }
  0x59   :  { %s139_s20 = sshll.u32 %s1644_s19, 4  ;;  %s161_s27 = sshll.u32 %s1645_s4, 4  ;;  %s140_s20 = int_to_ptr.vmem [resolvable:$true] %s139_s20  ;;  %s162_s27 = int_to_ptr.vmem [resolvable:$true] %s161_s27 }
  0x5a   :  { %s1365_s21 = scalar_lea.hbm %s2027_s10, 16 }
  0x5b   :  { %p1366_p7 = scmp.ne.s32.totalorder %s2027_s10, %s1365_s21  ;;  %p1369_p8 = scmp.lt.u32.totalorder %s1365_s21, %s2027_s10 }
  0x5d   :  { %p1371_p9 = pnand %p1369_p8, %p1366_p7 }
  0x5f   :  { %1374 = shalt.err (!%p1371_p9)
}
  0x60   :  { %s1375_s8 = scalar_lea.vmem %s140_s20, 16  ;;  %s1379_s30 = scalar_lea.vmem %s140_s20, 32 }
  0x61   :  { %p1376_p10 = scmp.ne.s32.totalorder %s140_s20, %s1375_s8  ;;  %p1380_p11 = scmp.lt.s32.totalorder %s140_s20, %s140_s20 }
  0x62   :  { %p1381_p12 = scmp.lt.s32.totalorder %s1379_s30, %s1375_s8 }
  0x64   :  { %p1382_p13 = por %p1381_p12, %p1380_p11 }
  0x66   :  { %p1383_p0 = pnand %p1382_p13, %p1376_p10 }
  0x68   :  { %1386 = shalt.err (!%p1383_p0)
}
  0x69   :  { %142 = dma.hbm_to_vmem [thread:$0]  %s2027_s10, 16, %s140_s20, [#allocation23]  }
  0x6a   :  { %s1387_s6 = scalar_lea.hbm %s2029_s12, 16 }
  0x6b   :  { %p1388_p1 = scmp.ne.s32.totalorder %s2029_s12, %s1387_s6  ;;  %p1391_p2 = scmp.lt.u32.totalorder %s1387_s6, %s2029_s12 }
  0x6d   :  { %p1393_p3 = pnand %p1391_p2, %p1388_p1 }
  0x6f   :  { %1396 = shalt.err (!%p1393_p3)
}
  0x70   :  { %s1397_s29 = scalar_lea.vmem %s162_s27, 16  ;;  %s1401_s21 = scalar_lea.vmem %s162_s27, 32 }
  0x71   :  { %p1398_p4 = scmp.ne.s32.totalorder %s162_s27, %s1397_s29  ;;  %p1402_p5 = scmp.lt.s32.totalorder %s162_s27, %s162_s27 }
  0x72   :  { %p1403_p6 = scmp.lt.s32.totalorder %s1401_s21, %s1397_s29 }
  0x74   :  { %p1404_p7 = por %p1403_p6, %p1402_p5 }
  0x76   :  { %p1405_p8 = pnand %p1404_p7, %p1398_p4 }
  0x78   :  { %1408 = shalt.err (!%p1405_p8)
}
  0x79   :  { %164 = dma.hbm_to_vmem [thread:$0]  %s2029_s12, 16, %s162_s27, [#allocation26]  }
  0x7a   :  { %s1646_s24 = smov [#allocation7]   ;;  %s1647_s22 = smov [#allocation12]  }
  0x7b   :  { %s39_s25 = sshll.u32 %s1646_s24, 4  ;;  %s61_s28 = sshll.u32 %s1647_s22, 4  ;;  %s40_s25 = int_to_ptr.vmem [resolvable:$true] %s39_s25  ;;  %s62_s28 = int_to_ptr.vmem [resolvable:$true] %s61_s28 }
  0x7c   :  { %s1409_s16 = scalar_lea.hbm %s2018_s1, 64 }
  0x7d   :  { %p1410_p9 = scmp.ne.s32.totalorder %s2018_s1, %s1409_s16  ;;  %p1413_p10 = scmp.lt.u32.totalorder %s1409_s16, %s2018_s1 }
  0x7f   :  { %p1415_p11 = pnand %p1413_p10, %p1410_p9 }
  0x81   :  { %1418 = shalt.err (!%p1415_p11)
}
  0x82   :  { %s1419_s12 = scalar_lea.vmem %s40_s25, 64  ;;  %p1424_p13 = scmp.lt.s32.totalorder %s40_s25, %s40_s25 }
  0x83   :  { %p1420_p12 = scmp.ne.s32.totalorder %s40_s25, %s1419_s12  ;;  %p1425_p0 = scmp.lt.s32.totalorder %s1419_s12, %s1419_s12 }
  0x85   :  { %p1426_p1 = por %p1425_p0, %p1424_p13 }
  0x87   :  { %p1427_p2 = pnand %p1426_p1, %p1420_p12 }
  0x89   :  { %1430 = shalt.err (!%p1427_p2)
}
  0x8a   :  { %42 = dma.hbm_to_vmem [thread:$0]  %s2018_s1, 64, %s40_s25, [#allocation8]  }
  0x8b   :  { %s1431_s2 = scalar_lea.hbm %s2020_s3, 16 }
  0x8c   :  { %p1432_p3 = scmp.ne.s32.totalorder %s2020_s3, %s1431_s2  ;;  %p1435_p4 = scmp.lt.u32.totalorder %s1431_s2, %s2020_s3 }
  0x8e   :  { %p1437_p5 = pnand %p1435_p4, %p1432_p3 }
  0x90   :  { %1440 = shalt.err (!%p1437_p5)
}
  0x91   :  { %s1441_s24 = scalar_lea.vmem %s62_s28, 16  ;;  %s1445_s22 = scalar_lea.vmem %s62_s28, 32 }
  0x92   :  { %p1442_p6 = scmp.ne.s32.totalorder %s62_s28, %s1441_s24  ;;  %p1446_p7 = scmp.lt.s32.totalorder %s62_s28, %s62_s28 }
  0x93   :  { %p1447_p8 = scmp.lt.s32.totalorder %s1445_s22, %s1441_s24 }
  0x95   :  { %p1448_p9 = por %p1447_p8, %p1446_p7 }
  0x97   :  { %p1449_p10 = pnand %p1448_p9, %p1442_p6 }
  0x99   :  { %1452 = shalt.err (!%p1449_p10)
}
  0x9a   :  { %64 = dma.hbm_to_vmem [thread:$0]  %s2020_s3, 16, %s62_s28, [#allocation11]  }
  0x9b   :  { %s1648_s8 = smov [#allocation15]   ;;  %s1649_s16 = smov [#allocation18]  }
  0x9c   :  { %s82_s30 = sshll.u32 %s1648_s8, 4  ;;  %s104_s17 = sshll.u32 %s1649_s16, 4  ;;  %s83_s30 = int_to_ptr.vmem [resolvable:$true] %s82_s30  ;;  %s1849_s17 = int_to_ptr.vmem [resolvable:$true] %s104_s17 }
  0x9d   :  { %s1453_s6 = scalar_lea.hbm %s2022_s5, 1024 }
  0x9e   :  { %p1454_p11 = scmp.ne.s32.totalorder %s2022_s5, %s1453_s6  ;;  %p1457_p12 = scmp.lt.u32.totalorder %s1453_s6, %s2022_s5 }
  0xa0   :  { %p1459_p13 = pnand %p1457_p12, %p1454_p11 }
  0xa2   :  { %1462 = shalt.err (!%p1459_p13)
}
  0xa3   :  { %s1463_s3 = scalar_lea.vmem %s83_s30, 1024  ;;  %p1468_p1 = scmp.lt.s32.totalorder %s83_s30, %s83_s30 }
  0xa4   :  { %p1464_p0 = scmp.ne.s32.totalorder %s83_s30, %s1463_s3  ;;  %p1469_p2 = scmp.lt.s32.totalorder %s1463_s3, %s1463_s3 }
  0xa6   :  { %p1470_p3 = por %p1469_p2, %p1468_p1 }
  0xa8   :  { %p1471_p4 = pnand %p1470_p3, %p1464_p0 }
  0xaa   :  { %1474 = shalt.err (!%p1471_p4)
}
  0xab   :  { %s2035_s28 = smov 64   ;;  %s1475_s10 = scalar_lea.hbm %s2024_s7, 1024 }
  0xac   :  { %88 = dma.hbm_to_vmem [thread:$0]  %s2022_s5, 1024, %s83_s30, [#allocation14], %s2035_s28, %s2035_s28, %s1638_s23  }
  0xad   :  { %p1476_p5 = scmp.ne.s32.totalorder %s2024_s7, %s1475_s10  ;;  %p1479_p6 = scmp.lt.u32.totalorder %s1475_s10, %s2024_s7 }
  0xaf   :  { %p1481_p7 = pnand %p1479_p6, %p1476_p5 }
  0xb1   :  { %1484 = shalt.err (!%p1481_p7)
}
  0xb2   :  { %s1485_s25 = scalar_lea.vmem %s1849_s17, 1024  ;;  %p1490_p9 = scmp.lt.s32.totalorder %s1849_s17, %s1849_s17 }
  0xb3   :  { %p1486_p8 = scmp.ne.s32.totalorder %s1849_s17, %s1485_s25  ;;  %p1491_p10 = scmp.lt.s32.totalorder %s1485_s25, %s1485_s25 }
  0xb5   :  { %p1492_p11 = por %p1491_p10, %p1490_p9 }
  0xb7   :  { %p1493_p12 = pnand %p1492_p11, %p1486_p8 }
  0xb9   :  { %1496 = shalt.err (!%p1493_p12)
}
  0xba   :  { %110 = dma.hbm_to_vmem [thread:$0]  %s2024_s7, 1024, %s1849_s17, [#allocation17], %s2035_s28, %s2035_s28, %s1638_s23  }
  0xbb   :  { %s1650_s30 = smov [#allocation21]   ;;  %s1651_s0 = smov [#allocation24]  }
  0xbc   :  { %s126_s16 = sshll.u32 %s1650_s30, 4  ;;  %s148_s18 = sshll.u32 %s1651_s0, 4  ;;  %s127_s16 = int_to_ptr.vmem [resolvable:$true] %s126_s16  ;;  %s1886_s18 = int_to_ptr.vmem [resolvable:$true] %s148_s18 }
  0xbd   :  { %s1497_s27 = scalar_lea.hbm %s2026_s9, 1024 }
  0xbe   :  { %p1498_p13 = scmp.ne.s32.totalorder %s2026_s9, %s1497_s27  ;;  %p1501_p0 = scmp.lt.u32.totalorder %s1497_s27, %s2026_s9 }
  0xc0   :  { %p1503_p1 = pnand %p1501_p0, %p1498_p13 }
  0xc2   :  { %1506 = shalt.err (!%p1503_p1)
}
  0xc3   :  { %s1507_s7 = scalar_lea.vmem %s127_s16, 1024  ;;  %p1512_p3 = scmp.lt.s32.totalorder %s127_s16, %s127_s16 }
  0xc4   :  { %p1508_p2 = scmp.ne.s32.totalorder %s127_s16, %s1507_s7  ;;  %p1513_p4 = scmp.lt.s32.totalorder %s1507_s7, %s1507_s7 }
  0xc6   :  { %p1514_p5 = por %p1513_p4, %p1512_p3 }
  0xc8   :  { %p1515_p6 = pnand %p1514_p5, %p1508_p2 }
  0xca   :  { %1518 = shalt.err (!%p1515_p6)
}
  0xcb   :  { %132 = dma.hbm_to_vmem [thread:$0]  %s2026_s9, 1024, %s127_s16, [#allocation20], %s2035_s28, %s2035_s28, %s1638_s23  }
  0xcc   :  { %s1519_s10 = scalar_lea.hbm %s2028_s11, 1024 }
  0xcd   :  { %p1520_p7 = scmp.ne.s32.totalorder %s2028_s11, %s1519_s10  ;;  %p1523_p8 = scmp.lt.u32.totalorder %s1519_s10, %s2028_s11 }
  0xcf   :  { %p1525_p9 = pnand %p1523_p8, %p1520_p7 }
  0xd1   :  { %1528 = shalt.err (!%p1525_p9)
}
  0xd2   :  { %s1529_s25 = scalar_lea.vmem %s1886_s18, 1024  ;;  %p1534_p11 = scmp.lt.s32.totalorder %s1886_s18, %s1886_s18 }
  0xd3   :  { %p1530_p10 = scmp.ne.s32.totalorder %s1886_s18, %s1529_s25  ;;  %p1535_p12 = scmp.lt.s32.totalorder %s1529_s25, %s1529_s25 }
  0xd5   :  { %p1536_p13 = por %p1535_p12, %p1534_p11 }
  0xd7   :  { %p1537_p0 = pnand %p1536_p13, %p1530_p10 }
  0xd9   :  { %1540 = shalt.err (!%p1537_p0)
}
  0xda   :  { %154 = dma.hbm_to_vmem [thread:$0]  %s2028_s11, 1024, %s1886_s18, [#allocation23], %s2035_s28, %s2035_s28, %s1638_s23  }
  0xdb   :  { %s1652_s8 = smov [#allocation27]   ;;  %s1653_s16 = smov [#allocation28]  }
  0xdc   :  { %s170_s30 = sshll.u32 %s1652_s8, 4  ;;  %s183_s0 = sshll.u32 %s1653_s16, 4  ;;  %s171_s30 = int_to_ptr.vmem [resolvable:$true] %s170_s30  ;;  %s184_s0 = int_to_ptr.vmem [resolvable:$true] %s183_s0 }
  0xdd   :  { %s1541_s27 = scalar_lea.hbm %s2030_s13, 1024 }
  0xde   :  { %p1542_p1 = scmp.ne.s32.totalorder %s2030_s13, %s1541_s27  ;;  %p1545_p2 = scmp.lt.u32.totalorder %s1541_s27, %s2030_s13 }
  0xe0   :  { %p1547_p3 = pnand %p1545_p2, %p1542_p1 }
  0xe2   :  { %1550 = shalt.err (!%p1547_p3)
}
  0xe3   :  { %s1551_s11 = scalar_lea.vmem %s171_s30, 1024  ;;  %p1556_p5 = scmp.lt.s32.totalorder %s171_s30, %s171_s30 }
  0xe4   :  { %p1552_p4 = scmp.ne.s32.totalorder %s171_s30, %s1551_s11  ;;  %p1557_p6 = scmp.lt.s32.totalorder %s1551_s11, %s1551_s11 }
  0xe6   :  { %p1558_p7 = por %p1557_p6, %p1556_p5 }
  0xe8   :  { %p1559_p8 = pnand %p1558_p7, %p1552_p4 }
  0xea   :  { %1562 = shalt.err (!%p1559_p8)
}
  0xeb   :  { %176 = dma.hbm_to_vmem [thread:$0]  %s2030_s13, 1024, %s171_s30, [#allocation26], %s2035_s28, %s2035_s28, %s1638_s23  }
  0xec   :  { %s1563_s29 = scalar_lea.hbm %s2031_s14, 16 }
  0xed   :  { %p1564_p9 = scmp.ne.s32.totalorder %s2031_s14, %s1563_s29  ;;  %p1567_p10 = scmp.lt.u32.totalorder %s1563_s29, %s2031_s14 }
  0xef   :  { %p1569_p11 = pnand %p1567_p10, %p1564_p9 }
  0xf1   :  { %1572 = shalt.err (!%p1569_p11)
}
  0xf2   :  { %s1573_s22 = scalar_lea.vmem %s184_s0, 16  ;;  %s1577_s1 = scalar_lea.vmem %s184_s0, 32 }
  0xf3   :  { %p1574_p12 = scmp.ne.s32.totalorder %s184_s0, %s1573_s22  ;;  %p1578_p13 = scmp.lt.s32.totalorder %s184_s0, %s184_s0 }
  0xf4   :  { %p1579_p0 = scmp.lt.s32.totalorder %s1577_s1, %s1573_s22 }
  0xf6   :  { %p1580_p1 = por %p1579_p0, %p1578_p13 }
  0xf8   :  { %p1581_p2 = pnand %p1580_p1, %p1574_p12 }
  0xfa   :  { %1584 = shalt.err (!%p1581_p2)
}
  0xfb   :  { %186 = dma.hbm_to_vmem [thread:$0]  %s2031_s14, 16, %s184_s0, [#allocation29]  }
  0xfc   :  { %1613 = dma.done.wait [#allocation8], 64  }
  0xfd   :  { %1614 = vsyncadd [#allocation8], 4294967232 }
  0xfe   :  { %1615 = dma.done.wait [#allocation11], 144  }
  0xff   :  { %1616 = vsyncadd [#allocation11], 4294967152 }
 0x100   :  { %1617 = dma.done.wait [#allocation14], 1280  }
 0x101   :  { %1618 = vsyncadd [#allocation14], 4294966016 }
 0x102   :  { %1619 = dma.done.wait [#allocation17], 1040  }
 0x103   :  { %1620 = vsyncadd [#allocation17], 4294966256 }
 0x104   :  { %1621 = dma.done.wait [#allocation20], 1040  }
 0x105   :  { %1622 = vsyncadd [#allocation20], 4294966256 }
 0x106   :  { %1623 = dma.done.wait [#allocation23], 1040  }
 0x107   :  { %1624 = vsyncadd [#allocation23], 4294966256 }
 0x108   :  { %1625 = dma.done.wait [#allocation26], 1040  }
 0x109   :  { %1626 = vsyncadd [#allocation26], 4294966256 }
 0x10a   :  { %1627 = dma.done.wait [#allocation29], 16  }
 0x10b   :  { %1628 = vsyncadd [#allocation29], 4294967280  ;;  %v1654_v0 = vmov 0.0   ;;  %vm1655_vm0 = vmmov 0   ;;  %v1214_v1 = vld [vmem:[#allocation18] sm:$0xff]   ;;  %v1215_v2 = vld [vmem:[#allocation18 + $0x8] sm:$0xff]  }
 0x10c   :  { %347 = vst [vmem:[#allocation3] sm:$0xff] %v1654_v0  ;;  %1096 = vmatprep.subr.bf16.mxu1 %v1654_v0  ;;  %1112 = vmatprep.mubr.msk.bf16.mxu1 %vm1655_vm0, %v1654_v0  ;;  %v1216_v3 = vld [vmem:[#allocation18 + $0x10] sm:$0xff]   ;;  %v1223_v4 = vld [vmem:[#allocation15] sm:$0xff]   ;;  %v1224_v6 = vld [vmem:[#allocation15 + $0x8] sm:$0xff]   ;;  %v1656_v28 = vmov 0   ;;  %s1631_s14 = smov 0  }
 0x10d   :  { %1076 = vmatprep.subr.bf16.mxu0 %v1654_v0  ;;  %1092 = vmatprep.mubr.msk.bf16.mxu0 %vm1655_vm0, %v1654_v0  ;;  %v1217_v5 = vld [vmem:[#allocation18 + $0x18] sm:$0xff]   ;;  %v1218_v7 = vld [vmem:[#allocation18 + $0x20] sm:$0xff]   ;;  %v1225_v8 = vld [vmem:[#allocation15 + $0x10] sm:$0xff]  }
 0x10e   :  { %1097 = vmatpush3.bf16.msra.mxu1 %v1214_v1  ;;  %1077 = vmatpush3.bf16.msra.mxu0 %v1223_v4  ;;  %v1219_v9 = vld [vmem:[#allocation18 + $0x28] sm:$0xff]   ;;  %v1226_v10 = vld [vmem:[#allocation15 + $0x18] sm:$0xff]   ;;  %v1227_v12 = vld [vmem:[#allocation15 + $0x20] sm:$0xff]  }
 0x10f   :  { %1098 = vmatprep.subr.bf16.mxu1 %v1654_v0  ;;  %1078 = vmatprep.subr.bf16.mxu0 %v1654_v0  ;;  %v1220_v11 = vld [vmem:[#allocation18 + $0x30] sm:$0xff]   ;;  %v1221_v13 = vld [vmem:[#allocation18 + $0x38] sm:$0xff]   ;;  %v1228_v14 = vld [vmem:[#allocation15 + $0x28] sm:$0xff]  }
 0x110   :  { %v1222_v15 = vld [vmem:[#allocation10] sm:$0xff]   ;;  %v1229_v16 = vld [vmem:[#allocation15 + $0x30] sm:$0xff]   ;;  %v1230_v17 = vld [vmem:[#allocation15 + $0x38] sm:$0xff]   ;;  %1213 = vset.pattern.permute.xlu0 %v1656_v28 }
 0x111   :  { %v234_v18 = vld [vmem:[#allocation7] sm:$0xf]  ;;  %v1232_v20 = vld [vmem:[#allocation21 + $0x8] sm:$0xff]   ;;  %v1233_v21 = vld [vmem:[#allocation21 + $0x10] sm:$0xff]  }
 0x112   :  { %1099 = vmatpush3.bf16.msra.mxu1 %v1215_v2  ;;  %1079 = vmatpush3.bf16.msra.mxu0 %v1224_v6  ;;  %v1231_v19 = vld [vmem:[#allocation21] sm:$0xff]   ;;  %v1234_v22 = vld [vmem:[#allocation21 + $0x18] sm:$0xff]   ;;  %v1236_v24 = vld [vmem:[#allocation21 + $0x28] sm:$0xff]  }
 0x113   :  { %1100 = vmatprep.subr.bf16.mxu1 %v1654_v0  ;;  %1080 = vmatprep.subr.bf16.mxu0 %v1654_v0  ;;  %v1235_v23 = vld [vmem:[#allocation21 + $0x20] sm:$0xff]   ;;  %v1237_v25 = vld [vmem:[#allocation21 + $0x30] sm:$0xff]   ;;  %v1238_v26 = vld [vmem:[#allocation21 + $0x38] sm:$0xff]  }
 0x114   :  { %v613_v27 = vld [vmem:[#allocation13] sm:$0xff]  ;;  %v614_v29 = vld [vmem:[#allocation13 + $0x8] sm:$0xff]  ;;  %v986_v30 = vld [vmem:[#allocation19] ss:$0 sm:$0xff] }
 0x115   :  { %617 = vperm.xlu0 %1213, %v613_v27  }
 0x116   :  { %1101 = vmatpush3.bf16.msra.mxu1 %v1216_v3  ;;  %1081 = vmatpush3.bf16.msra.mxu0 %v1225_v8 }
 0x117   :  { %1102 = vmatprep.subr.bf16.mxu1 %v1654_v0  ;;  %1082 = vmatprep.subr.bf16.mxu0 %v1654_v0 }
 0x119   :  { %622 = vperm.xlu0 %1213, %v614_v29  }
 0x11a   :  { %1103 = vmatpush3.bf16.msra.mxu1 %v1217_v5  ;;  %1083 = vmatpush3.bf16.msra.mxu0 %v1226_v10  ;;  %v977_v5 = vld [vmem:[#allocation16] ss:$0 sm:$0xff] }
 0x11b   :  { %1104 = vmatprep.subr.bf16.mxu1 %v1654_v0  ;;  %1084 = vmatprep.subr.bf16.mxu0 %v1654_v0 }
 0x11e   :  { %1105 = vmatpush3.bf16.msra.mxu1 %v1218_v7  ;;  %1085 = vmatpush3.bf16.msra.mxu0 %v1227_v12  ;;  %v998_v12 = vld [vmem:[#allocation22] ss:$0 sm:$0xff] }
 0x11f   :  { %1106 = vmatprep.subr.bf16.mxu1 %v1654_v0  ;;  %1086 = vmatprep.subr.bf16.mxu0 %v1654_v0 }
 0x122   :  { %1107 = vmatpush3.bf16.msra.mxu1 %v1219_v9  ;;  %1087 = vmatpush3.bf16.msra.mxu0 %v1228_v14 }
 0x123   :  { %1108 = vmatprep.subr.bf16.mxu1 %v1654_v0  ;;  %1088 = vmatprep.subr.bf16.mxu0 %v1654_v0 }
 0x126   :  { %1109 = vmatpush3.bf16.msra.mxu1 %v1220_v11  ;;  %1089 = vmatpush3.bf16.msra.mxu0 %v1229_v16 }
 0x127   :  { %1110 = vmatprep.subr.bf16.mxu1 %v1654_v0  ;;  %1090 = vmatprep.subr.bf16.mxu0 %v1654_v0 }
 0x12a   :  { %1111 = vmatpush3.bf16.msra.mxu1 %v1221_v13  ;;  %1091 = vmatpush3.bf16.msra.mxu0 %v1230_v17 }
 0x12b   :  { %1116 = vmatprep.subr.bf16.mxu0 %v1654_v0 }
 0x12d   :  { %1113 = vmatmul.mubr.bf16.vlgmr.msra.gmra.mrb[0].mxu1 %v1222_v15  ;;  %1093 = vmatmul.mubr.bf16.vlgmr.msra.gmra.mrb[0].mxu0 %v234_v18 }
 0x12e   :  { %1132 = vmatprep.mubr.msk.bf16.mxu0 %vm1655_vm0, %v1654_v0  ;;  %1117 = vmatpush3.bf16.msra.mxu0 %v1231_v19 }
 0x12f   :  { %1118 = vmatprep.subr.bf16.mxu0 %v1654_v0 }
 0x132   :  { %1119 = vmatpush3.bf16.msra.mxu0 %v1232_v20 }
 0x133   :  { %1120 = vmatprep.subr.bf16.mxu0 %v1654_v0 }
 0x136   :  { %1121 = vmatpush3.bf16.msra.mxu0 %v1233_v21 }
 0x137   :  { %1122 = vmatprep.subr.bf16.mxu0 %v1654_v0 }
 0x13a   :  { %1123 = vmatpush3.bf16.msra.mxu0 %v1234_v22 }
 0x13b   :  { %1124 = vmatprep.subr.bf16.mxu0 %v1654_v0 }
 0x13e   :  { %1125 = vmatpush3.bf16.msra.mxu0 %v1235_v23 }
 0x13f   :  { %1126 = vmatprep.subr.bf16.mxu0 %v1654_v0 }
 0x142   :  { %1127 = vmatpush3.bf16.msra.mxu0 %v1236_v24 }
 0x143   :  { %1128 = vmatprep.subr.bf16.mxu0 %v1654_v0 }
 0x146   :  { %1129 = vmatpush3.bf16.msra.mxu0 %v1237_v25 }
 0x147   :  { %1130 = vmatprep.subr.bf16.mxu0 %v1654_v0 }
 0x14a   :  { %1131 = vmatpush3.bf16.msra.mxu0 %v1238_v26 }
 0x194   :  { %v618_v11 = vpop.permute.xlu0 %617 }
 0x198   :  { %v623_v20 = vpop.permute.xlu0 %622 }
 0x200   :  { %v461_v31 = vpop.f32.mrb[0].mxu1  ;;  %v340_v6 = vpop.f32.mrb[0].mxu0 }
 0x201   :  { %v462_v32 = vadd.f32 %v986_v30, %v461_v31  ;;  %v1114_v33 = vpop.f32.mrb[1].mxu1  ;;  %v341_v7 = vadd.f32 %v977_v5, %v340_v6  ;;  %v1094_v8 = vpop.f32.mrb[1].mxu0 }
 0x202   :  { %v464_v34 = vpop.f32.mrb[2].mxu1  ;;  %v343_v9 = vpop.f32.mrb[2].mxu0 }
 0x203   :  { %v470_v35 = vand.u32 2147483647, %v462_v32  ;;  %v465_v36 = vadd.f32 %v986_v30, %v464_v34  ;;  %v1115_v37 = vpop.f32.mrb[3].mxu1  ;;  %v468_v57 = vmax.f32 %v462_v32, 0.0  ;;  %346 = vst [vmem:[#allocation2] sm:$0xff] %v341_v7  ;;  %v1095_v10 = vpop.f32.mrb[3].mxu0 }
 0x205   :  { %v472_v38 = vsub.f32 0.0, %v470_v35  ;;  %v471_v39 = vand.u32 2147483647, %v465_v36  ;;  %v469_v62 = vmax.f32 %v465_v36, 0.0 }
 0x207   :  { %v474_v40 = vmul.f32 1.442695, %v472_v38  ;;  %v473_v41 = vsub.f32 0.0, %v471_v39 }
 0x209   :  { %1239 = vpow2.f32 %v474_v40  ;;  %v476_v42 = vmul.f32 1.442695, %v473_v41 }
 0x20b   :  { %1241 = vpow2.f32 %v476_v42 }
 0x213   :  { %v1240_v43 = vpop.eup %1239 }
 0x214   :  { %v478_v44 = vadd.f32 1.0, %v1240_v43  ;;  %v481_v47 = vmul.f32 -0.5, %v1240_v43  ;;  %v484_v50 = vand.u32 2147483647, %v1240_v43 }
 0x215   :  { %v1242_v45 = vpop.eup %1241 }
 0x216   :  { %1243 = vlog2.f32 %v478_v44  ;;  %v487_v46 = vadd.f32 1.0, %v1242_v45  ;;  %v490_v48 = vmul.f32 -0.5, %v1242_v45  ;;  %v482_v49 = vadd.f32 1.0, %v481_v47 }
 0x217   :  { %v493_v53 = vand.u32 2147483647, %v1242_v45  ;;  %vm485_vm1 = vcmp.lt.f32.partialorder %v484_v50, 0.0004427343 }
 0x218   :  { %1245 = vlog2.f32 %v487_v46  ;;  %v491_v51 = vadd.f32 1.0, %v490_v48  ;;  %v483_v55 = vmul.f32 %v1240_v43, %v482_v49 }
 0x219   :  { %vm494_vm2 = vcmp.lt.f32.partialorder %v493_v53, 0.0004427343 }
 0x21a   :  { %v492_v60 = vmul.f32 %v1242_v45, %v491_v51 }
 0x220   :  { %v1244_v52 = vpop.eup %1243 }
 0x221   :  { %v480_v54 = vmul.f32 0.6931472, %v1244_v52 }
 0x222   :  { %v1246_v56 = vpop.eup %1245 }
 0x223   :  { %v486_v58 = vsel %vm485_vm1, %v483_v55, %v480_v54  ;;  %v489_v59 = vmul.f32 0.6931472, %v1246_v56 }
 0x224   :  { %v496_v61 = vadd.f32 %v486_v58, %v468_v57 }
 0x225   :  { %v495_v63 = vsel %vm494_vm2, %v492_v60, %v489_v59 }
 0x226   :  { %v497_v1 = vadd.f32 %v495_v63, %v469_v62  ;;  %v996_v2 = vadd.f32 -0.6931472, %v496_v61 }
 0x228   :  { %v997_v3 = vadd.f32 -0.6931472, %v497_v1 }
 0x22a   :  { %v500_v4 = vpack.c.bf16 %v997_v3, %v996_v2 }
 0x22c   :  { %1133 = vmatmul.mubr.bf16.vlgmr.msra.gmra.mrb[4].mxu0 %v500_v4 }
 0x2ff   :  { %v606_v13 = vpop.f32.mrb[4].mxu0 }
 0x300   :  { %v607_v14 = vadd.f32 %v998_v12, %v606_v13  ;;  %v1134_v15 = vpop.f32.mrb[5].mxu0 }
 0x301   :  { %v609_v16 = vpop.f32.mrb[6].mxu0 }
 0x302   :  { %v625_v17 = vmul.f32 %v618_v11, %v607_v14  ;;  %v610_v18 = vadd.f32 %v998_v12, %v609_v16  ;;  %v1135_v19 = vpop.f32.mrb[7].mxu0 }
 0x304   :  { %v626_v21 = vmul.f32 %v623_v20, %v610_v18 }
 0x305 LB: > { %s635_s28 = sld [smem:[#allocation6 + %s1633_s14]]  ;;  %s638_s9 = scalar_lea.vmem [#allocation4], %s1633_s14  ;;  %s1633_s14 = sphi %s1631_s14, %s633_s14  }
 0x306   : > { %s633_s14 = sadd.s32 1, %s1633_s14  }
 0x307   : > { %p630_p3 = scmp.ge.s32.totalorder %s633_s14, 16  }
 0x308   :  { %1136 = vmatprep.subr.bf16.mxu1 (%p630_p3), %v1654_v0  ;;  %1138 = vmatprep.mubr.msk.bf16.mxu1 (%p630_p3), %vm1655_vm0, %v1654_v0  ;;  %v644_v25 = vlaneseq (%p630_p3)  ;;  %v1007_v28 = vld [vmem:[#allocation12] ss:$0 sm:$0xff] (%p630_p3)  ;;  %vm657_vm4 = vcmask (%p630_p3), 130048   ;;  %v1247_v32 = vld [vmem:[#allocation24] sm:$0xff] (%p630_p3)   ;;  %v1249_v35 = vld [vmem:[#allocation24 + $0x10] sm:$0xff] (%p630_p3)   ;;  %s1657_s5 = smov (%p630_p3), [#allocation30]  }
 0x309   :  { %632 = sbr.rel (!%p630_p3) target bundleno = 773 (0x305), region = 149  ;;  %1162 = vmatprep.subr.bf16.mxu0 (%p630_p3), %v1654_v0  ;;  %1178 = vmatprep.mubr.msk.bf16.mxu0 (%p630_p3), %vm1655_vm0, %v1654_v0  ;;  %v1248_v34 = vld [vmem:[#allocation24 + $0x8] sm:$0xff] (%p630_p3)   ;;  %v1250_v36 = vld [vmem:[#allocation24 + $0x18] sm:$0xff] (%p630_p3)   ;;  %v1251_v37 = vld [vmem:[#allocation24 + $0x20] sm:$0xff] (%p630_p3)   ;;  %s954_s8 = sshll.u32 (%p630_p3), %s1657_s5, 4  ;;  %s955_s8 = int_to_ptr.vmem [resolvable:$true] %s954_s8 }
 0x30a   :  { %v645_v29 = vshrl.u32 (%p630_p3), %v644_v25, 7  ;;  %v1252_v38 = vld [vmem:[#allocation24 + $0x28] sm:$0xff] (%p630_p3)   ;;  %v1253_v39 = vld [vmem:[#allocation24 + $0x30] sm:$0xff] (%p630_p3)   ;;  %v1254_v40 = vld [vmem:[#allocation24 + $0x38] sm:$0xff] (%p630_p3)   ;;  %s1585_s30 = scalar_lea.vmem (%p630_p3), %s955_s8, 128  ;;  %p1590_p5 = scmp.lt.s32.totalorder (%p630_p3), %s955_s8, %s955_s8 }
 0x30b   : > { %s636_s25 = scalar_lea.vmem [#allocation2], %s635_s28  ;;  %v655_v41 = vld [vmem:[#allocation3] sm:$0xff] (%p630_p3)  ;;  %v1257_v50 = vld [vmem:[#allocation27 + $0x10] sm:$0xff] (%p630_p3)   ;;  %v1258_v51 = vld [vmem:[#allocation27 + $0x18] sm:$0xff] (%p630_p3)   ;;  %p1586_p4 = scmp.ne.s32.totalorder (%p630_p3), %s955_s8, %s1585_s30 }
 0x30c   : > { %v637_v22 = vld [vmem:[%s636_s25] sm:$0x1]  ;;  %vm651_vm3 = vcmp.eq.s32.totalorder (%p630_p3), %v645_v29, %v1007_v28  ;;  %v1255_v48 = vld [vmem:[#allocation27] sm:$0xff] (%p630_p3)   ;;  %v1256_v49 = vld [vmem:[#allocation27 + $0x8] sm:$0xff] (%p630_p3)   ;;  %p1591_p6 = scmp.lt.s32.totalorder (%p630_p3), %s1585_s30, %s1585_s30 }
 0x30d   : > { %639 = vst [vmem:[%s638_s9] sm:$0x1] %v637_v22  ;;  %v1008_v31 = vsel (%p630_p3), %vm651_vm3, 1.0, %v1654_v0  ;;  %1163 = vmatpush3.bf16.msra.mxu0 (%p630_p3), %v1255_v48  ;;  %v1259_v52 = vld [vmem:[#allocation27 + $0x20] sm:$0xff] (%p630_p3)   ;;  %v1260_v53 = vld [vmem:[#allocation27 + $0x28] sm:$0xff] (%p630_p3)   ;;  %v1261_v54 = vld [vmem:[#allocation27 + $0x30] sm:$0xff] (%p630_p3)  }
 0x30e   :  { %v654_v33 = vpack.c.bf16 (%p630_p3), %v1008_v31, %v1008_v31  ;;  %1164 = vmatprep.subr.bf16.mxu0 (%p630_p3), %v1654_v0  ;;  %v1262_v55 = vld [vmem:[#allocation27 + $0x38] sm:$0xff] (%p630_p3)   ;;  %v1020_v14 = vld [vmem:[#allocation28] ss:$0 sm:$0xff] (%p630_p3)  ;;  %p1592_p7 = por (%p630_p3), %p1591_p6, %p1590_p5 }
 0x30f   :  { %v1010_v56 = vld [vmem:[#allocation25] ss:$0 sm:$0xff] (%p630_p3) }
 0x310   :  { %p1593_p8 = pnand %p1592_p7, %p1586_p4 }
 0x311   :  { %1165 = vmatpush3.bf16.msra.mxu0 %v1256_v49 }
 0x312   :  { %1166 = vmatprep.subr.bf16.mxu0 %v1654_v0 }
 0x314   :  { %v640_v23 = vld [vmem:[#allocation4] sm:$0xff]  ;;  %v641_v24 = vld [vmem:[#allocation4 + $0x8] sm:$0xff] }
 0x315   :  { %v642_v26 = vmul.f32 %v640_v23, %v625_v17  ;;  %v643_v27 = vmul.f32 %v641_v24, %v626_v21  ;;  %1167 = vmatpush3.bf16.msra.mxu0 %v1257_v50 }
 0x316   :  { %1168 = vmatprep.subr.bf16.mxu0 %v1654_v0 }
 0x317   :  { %v656_v30 = vpack.c.bf16 %v643_v27, %v642_v26 }
 0x319   :  { %1137 = vmatpush3.bf16.msra.mxu1 %v656_v30  ;;  %1169 = vmatpush3.bf16.msra.mxu0 %v1258_v51 }
 0x31a   :  { %1142 = vmatprep.subr.bf16.mxu1 %v1654_v0  ;;  %1170 = vmatprep.subr.bf16.mxu0 %v1654_v0 }
 0x31c   :  { %1139 = vmatmul.mubr.msk.bf16.vlgmr.msra.gmra.mrb[4].mxu1 %vm657_vm4, %v654_v33 }
 0x31d   :  { %1143 = vmatpush3.bf16.msra.mxu1 %v1247_v32  ;;  %1158 = vmatprep.mubr.msk.bf16.mxu1 %vm1655_vm0, %v1654_v0 }
 0x31e   :  { %1144 = vmatprep.subr.bf16.mxu1 %v1654_v0  ;;  %1171 = vmatpush3.bf16.msra.mxu0 %v1259_v52 }
 0x31f   :  { %1172 = vmatprep.subr.bf16.mxu0 %v1654_v0 }
 0x321   :  { %1145 = vmatpush3.bf16.msra.mxu1 %v1248_v34 }
 0x322   :  { %1146 = vmatprep.subr.bf16.mxu1 %v1654_v0  ;;  %1173 = vmatpush3.bf16.msra.mxu0 %v1260_v53 }
 0x323   :  { %1174 = vmatprep.subr.bf16.mxu0 %v1654_v0 }
 0x325   :  { %1147 = vmatpush3.bf16.msra.mxu1 %v1249_v35 }
 0x326   :  { %1148 = vmatprep.subr.bf16.mxu1 %v1654_v0  ;;  %1175 = vmatpush3.bf16.msra.mxu0 %v1261_v54 }
 0x327   :  { %1176 = vmatprep.subr.bf16.mxu0 %v1654_v0 }
 0x329   :  { %1149 = vmatpush3.bf16.msra.mxu1 %v1250_v36 }
 0x32a   :  { %1150 = vmatprep.subr.bf16.mxu1 %v1654_v0  ;;  %1177 = vmatpush3.bf16.msra.mxu0 %v1262_v55 }
 0x32d   :  { %1151 = vmatpush3.bf16.msra.mxu1 %v1251_v37 }
 0x32e   :  { %1152 = vmatprep.subr.bf16.mxu1 %v1654_v0 }
 0x331   :  { %1153 = vmatpush3.bf16.msra.mxu1 %v1252_v38 }
 0x332   :  { %1154 = vmatprep.subr.bf16.mxu1 %v1654_v0 }
 0x335   :  { %1155 = vmatpush3.bf16.msra.mxu1 %v1253_v39 }
 0x336   :  { %1156 = vmatprep.subr.bf16.mxu1 %v1654_v0 }
 0x339   :  { %1157 = vmatpush3.bf16.msra.mxu1 %v1254_v40 }
 0x3ef   :  { %v695_v42 = vpop.f32.mrb[4].mxu1 }
 0x3f0   :  { %v701_v43 = vadd.f32 %v695_v42, %v655_v41  ;;  %v1140_v44 = vpop.f32.mrb[5].mxu1 }
 0x3f1   :  { %v698_v45 = vpop.f32.mrb[6].mxu1 }
 0x3f2   :  { %702 = vst [vmem:[#allocation3] sm:$0xff] %v701_v43  ;;  %v1141_v46 = vpop.f32.mrb[7].mxu1  ;;  %v707_v47 = vpack.c.bf16 %v701_v43, %v701_v43 }
 0x3f4   :  { %1159 = vmatmul.mubr.bf16.vlgmr.msra.gmra.mrb[8].mxu1 %v707_v47 }
 0x4c7   :  { %v813_v57 = vpop.f32.mrb[8].mxu1 }
 0x4c8   :  { %v814_v58 = vadd.f32 %v1010_v56, %v813_v57  ;;  %v1160_v59 = vpop.f32.mrb[9].mxu1 }
 0x4c9   :  { %v816_v60 = vpop.f32.mrb[10].mxu1 }
 0x4ca   :  { %v820_v61 = vand.u32 2147483647, %v814_v58  ;;  %v1161_v62 = vpop.f32.mrb[11].mxu1  ;;  %v819_v9 = vmax.f32 %v814_v58, 0.0 }
 0x4cc   :  { %v821_v63 = vsub.f32 0.0, %v820_v61 }
 0x4ce   :  { %v822_v1 = vmul.f32 1.442695, %v821_v63 }
 0x4d0   :  { %1263 = vpow2.f32 %v822_v1 }
 0x4da   :  { %v1264_v2 = vpop.eup %1263 }
 0x4db   :  { %v824_v3 = vadd.f32 1.0, %v1264_v2  ;;  %v827_v4 = vmul.f32 -0.5, %v1264_v2  ;;  %v830_v6 = vand.u32 2147483647, %v1264_v2 }
 0x4dd   :  { %1265 = vlog2.f32 %v824_v3  ;;  %v828_v5 = vadd.f32 1.0, %v827_v4  ;;  %vm831_vm5 = vcmp.lt.f32.partialorder %v830_v6, 0.0004427343 }
 0x4df   :  { %v829_v8 = vmul.f32 %v1264_v2, %v828_v5 }
 0x4e7   :  { %v1266_v7 = vpop.eup %1265 }
 0x4e8   :  { %v826_v0 = vmul.f32 0.6931472, %v1266_v7 }
 0x4ea   :  { %v832_v10 = vsel %vm831_vm5, %v829_v8, %v826_v0 }
 0x4eb   :  { %v833_v11 = vadd.f32 %v832_v10, %v819_v9 }
 0x4ed   :  { %v1019_v12 = vadd.f32 -0.6931472, %v833_v11 }
 0x4ef   :  { %v835_v13 = vpack.c.bf16 %v1019_v12, %v1019_v12 }
 0x4f1   :  { %1179 = vmatmul.mubr.bf16.vlgmr.msra.gmra.mrb[8].mxu0 %v835_v13 }
 0x5c4   :  { %v941_v15 = vpop.f32.mrb[8].mxu0 }
 0x5c5   :  { %v942_v16 = vadd.f32 %v1020_v14, %v941_v15  ;;  %v1180_v17 = vpop.f32.mrb[9].mxu0 }
 0x5c6   :  { %v944_v18 = vpop.f32.mrb[10].mxu0 }
 0x5c7   :  { %947 = vst [vmem:[#allocation30] sm:$0xff] %v942_v16  ;;  %v1181_v19 = vpop.f32.mrb[11].mxu0 }
 0x5c8   :  { %1596 = shalt.err (!%p1593_p8)
}
 0x5c9   :  { %s1597_s6 = scalar_lea.hbm %s2032_s15, 128 }
 0x5ca   :  { %p1598_p9 = scmp.ne.s32.totalorder %s2032_s15, %s1597_s6  ;;  %p1601_p10 = scmp.lt.u32.totalorder %s1597_s6, %s2032_s15 }
 0x5cc   :  { %p1603_p11 = pnand %p1601_p10, %p1598_p9 }
 0x5ce   :  { %1606 = shalt.err (!%p1603_p11)
}
 0x5cf   :  { %957 = dma.vmem_to_hbm [thread:$0]  %s955_s8, 128, %s2032_s15, [#allocation9]  }
 0x5d0   :  { %1629 = dma.done.wait [#allocation9], 128  }
 0x5d1   :  { %1630 = vsyncadd [#allocation9], 4294967168 }
 0x5d2   :  { %961 = vsyncpa [#allocation8], 1 }
 0x5d3   :  { %962 = vsyncpa [#allocation11], 1 }
 0x5d4   :  { %963 = vsyncpa [#allocation14], 1 }
 0x5d5   :  { %964 = vsyncpa [#allocation17], 1 }
 0x5d6   :  { %965 = vsyncpa [#allocation20], 1 }
 0x5d7   :  { %966 = vsyncpa [#allocation23], 1 }
 0x5d8   :  { %967 = vsyncpa [#allocation26], 1 }
 0x5d9   :  { %968 = vsyncpa [#allocation29], 1 }
 0x5da   :  { %969 = vsyncpa [#allocation9], 1 }

</bundles_post_ra>
